<compile_context>
chip_gen: v7x
topology: tpu7x:2x2x1
jax: 0.10.0
libtpu: 0.0.40
codegen_flags: <defaults>
</compile_context>

<pallas_src>
import jax
import jax.numpy as jnp
from jax.experimental import pallas as pl
from jax.experimental.pallas import tpu as pltpu

IN_FEATURES = 784
HIDDEN = 20
OUT_FEATURES = 10
HIDDEN_PAD = 128   # lane-dense hidden width (logical 20)
OUT_PAD = 128      # lane-dense output width (logical 10)


def _cdiv(a, b):
    return -(-a // b)


def _round_up(n, m):
    return ((n + m - 1) // m) * m


def _vmem_budget_bytes():
    """Generation-aware VMEM allowance: ~3/4 of per-core VMEM, conservative fallback."""
    cap = None
    try:
        info = pltpu.get_tpu_info()
        cap = int(getattr(info, "vmem_capacity_bytes", 0))
    except Exception:
        cap = None
    if not cap or cap <= 0:
        cap = 64 * 1024 * 1024          # conservative: v7x per-TensorCore VMEM
    return min(int(cap * 3 // 4), 112 * 1024 * 1024)


def _choose_tile(batch, tb_cap):
    """Pick a batch tile: as large as the VMEM budget allows, 16-row aligned (bf16
    sublane packing), minimal over-padding, and an even tile count when multi-tile
    so both v7x TensorCores stay busy."""
    n = max(1, _cdiv(batch, tb_cap))
    if n > 1 and n % 2 == 1:
        n += 1
    tb = _round_up(_cdiv(batch, n), 16)
    return min(tb, _round_up(batch, 8))


def mlp_kernel(x_ref, w1_ref, b1_ref, w2_ref, b2_ref, w3_ref, b3_ref, o_ref):
    """One batch tile: (TB,784)@(784,128) -> sigmoid -> @(128,128) -> sigmoid -> @(128,128)."""
    cdt = w1_ref.dtype
    # In-kernel cast of the streamed x tile (VPU work, hidden under the HBM-bound pipeline).
    x = x_ref[...].astype(cdt)
    # fc1 + sigmoid (MXU accumulates in f32; bias/sigmoid stay f32)
    h1 = jnp.dot(x, w1_ref[...], preferred_element_type=jnp.float32)
    h1 = jax.nn.sigmoid(h1 + b1_ref[...])
    # fc2 + sigmoid
    h2 = jnp.dot(h1.astype(cdt), w2_ref[...], preferred_element_type=jnp.float32)
    h2 = jax.nn.sigmoid(h2 + b2_ref[...])
    # fc3 (no activation) -- lane-dense (TB, 128) bf16 store
    o = jnp.dot(h2.astype(cdt), w3_ref[...], preferred_element_type=jnp.float32) + b3_ref[...]
    o_ref[...] = o.astype(o_ref.dtype)


def init_params(key):
    """PyTorch-style default init: U(-1/sqrt(fan_in), 1/sqrt(fan_in)). Logical (unpadded) f32."""
    def linear(key, fan_in, fan_out):
        kw, kb = jax.random.split(key)
        bound = 1.0 / (fan_in ** 0.5)
        w = jax.random.uniform(kw, (fan_in, fan_out), jnp.float32, -bound, bound)  # (in, out)
        b = jax.random.uniform(kb, (1, fan_out), jnp.float32, -bound, bound)
        return w, b

    k1, k2, k3 = jax.random.split(key, 3)
    w1, b1 = linear(k1, IN_FEATURES, HIDDEN)
    w2, b2 = linear(k2, HIDDEN, HIDDEN)
    w3, b3 = linear(k3, HIDDEN, OUT_FEATURES)
    return (w1, b1, w2, b2, w3, b3)


def pack_params(params, compute_dtype=jnp.bfloat16):
    """Pad logical params to lane-dense 128-wide layouts; weights in compute dtype, biases f32.

    Zero-padded weight ROWS guarantee that sigmoid(0)=0.5 activations living in padded
    lanes contribute exactly 0 to the next layer, so results match the unpadded math
    (up to dtype rounding).
    """
    w1, b1, w2, b2, w3, b3 = params

    def pad_w(w, rows, cols):
        out = jnp.zeros((rows, cols), jnp.float32)
        return out.at[: w.shape[0], : w.shape[1]].set(w).astype(compute_dtype)

    def pad_b(b, cols):
        out = jnp.zeros((1, cols), jnp.float32)
        return out.at[:, : b.shape[1]].set(b)  # biases stay f32

    return (
        pad_w(w1, IN_FEATURES, HIDDEN_PAD), pad_b(b1, HIDDEN_PAD),
        pad_w(w2, HIDDEN_PAD, HIDDEN_PAD),  pad_b(b2, HIDDEN_PAD),
        pad_w(w3, HIDDEN_PAD, OUT_PAD),     pad_b(b3, OUT_PAD),
    )


def dense_net_forward(x, packed_params, *, block_batch=16384):
    """x: (B, 784) f32 or bf16 (streamed as-is; no wrapper-side cast/pad HBM passes).
    packed_params from pack_params(). Returns (B, 10) float32."""
    w1, b1, w2, b2, w3, b3 = packed_params
    B, K = x.shape
    H = w1.shape[1]   # 128
    O = w3.shape[1]   # 128

    x_elt = x.dtype.itemsize
    w_elt = w1.dtype.itemsize
    out_elt = jnp.dtype(jnp.bfloat16).itemsize

    weight_bytes = (K * H + 2 * H * H) * w_elt + 3 * H * 4

    # Per-row VMEM footprint: double-buffered x tile + in-kernel cast copy,
    # double-buffered bf16 out tile, f32/bf16 intermediates (h1, h2, logits, casts).
    per_row = 2 * K * x_elt + K * w_elt + 2 * O * out_elt + 5 * H * 4
    budget = _vmem_budget_bytes()
    tb_cap = (budget - 2 * weight_bytes - (2 << 20)) // per_row
    tb_cap = max(16, (tb_cap // 16) * 16)
    tb_cap = min(tb_cap, int(block_batch))

    TB = _choose_tile(B, tb_cap)
    num_tiles = pl.cdiv(B, TB)   # last block may be partial: OOB reads garbage, OOB writes dropped

    cost = pl.CostEstimate(
        flops=2 * B * (K * H + H * H + H * O),
        transcendentals=2 * B * H,                      # two sigmoids per row
        bytes_accessed=B * K * x_elt + weight_bytes + B * O * out_elt,
    )

    batch_map = lambda i: (i, 0)
    const_map = lambda i: (0, 0)

    out = pl.pallas_call(
        mlp_kernel,
        grid=(num_tiles,),
        in_specs=[
            pl.BlockSpec((TB, K), batch_map),   # x tile streams through the pipeline
            pl.BlockSpec((K, H), const_map),    # weights/biases: fetched once, VMEM-resident
            pl.BlockSpec((1, H), const_map),
            pl.BlockSpec((H, H), const_map),
            pl.BlockSpec((1, H), const_map),
            pl.BlockSpec((H, O), const_map),
            pl.BlockSpec((1, O), const_map),
        ],
        out_specs=pl.BlockSpec((TB, O), batch_map),
        out_shape=jax.ShapeDtypeStruct((B, O), jnp.bfloat16),
        compiler_params=pltpu.CompilerParams(
            dimension_semantics=("parallel",),   # megacore sharding on v7x; no-op on v5e/v6e
            vmem_limit_bytes=int(budget),
        ),
        cost_estimate=cost,
    )(x, w1, b1, w2, b2, w3, b3)

    return out[:, :OUT_FEATURES].astype(jnp.float32)


if __name__ == "__main__":
    key = jax.random.PRNGKey(0)
    kx, kp = jax.random.split(key)

    params = init_params(kp)                     # logical f32 params (module semantics)
    packed = pack_params(params, compute_dtype=jnp.bfloat16)

    # small-shape smoke test (single exact tile)
    B = 8
    x = jax.random.normal(kx, (B, IN_FEATURES), dtype=jnp.float32)
    out = jax.block_until_ready(dense_net_forward(x, packed))
    assert out.shape == (B, OUT_FEATURES)
    assert out.dtype == jnp.float32

    # reference with identical dtype handling (bf16 weights, f32 accumulation, bf16 out store)
    def ref_packed(xv):
        pw1, pb1, pw2, pb2, pw3, pb3 = packed
        cdt = pw1.dtype
        h = jax.nn.sigmoid(jnp.dot(xv.astype(cdt), pw1, preferred_element_type=jnp.float32) + pb1)
        h = jax.nn.sigmoid(jnp.dot(h.astype(cdt), pw2, preferred_element_type=jnp.float32) + pb2)
        o = jnp.dot(h.astype(cdt), pw3, preferred_element_type=jnp.float32) + pb3
        return o[:, :OUT_FEATURES].astype(jnp.bfloat16).astype(jnp.float32)

    # full-precision reference (original PyTorch module semantics)
    def ref_f32(xv):
        w1, b1, w2, b2, w3, b3 = params
        h = jax.nn.sigmoid(xv @ w1 + b1)
        h = jax.nn.sigmoid(h @ w2 + b2)
        return h @ w3 + b3

    assert jnp.allclose(out, ref_packed(x), atol=2e-2, rtol=2e-2)
    assert jnp.allclose(out, ref_f32(x), atol=6e-2, rtol=6e-2)

    # multi-tile grid + ragged (partial) last block, no wrapper-side padding pass
    B2 = 20
    x2 = jax.random.normal(jax.random.PRNGKey(1), (B2, IN_FEATURES), dtype=jnp.float32)
    out2 = jax.block_until_ready(dense_net_forward(x2, packed, block_batch=8))
    assert out2.shape == (B2, OUT_FEATURES)
    assert jnp.allclose(out2, ref_packed(x2), atol=2e-2, rtol=2e-2)

    # bf16-producer path: x already bf16, no f32 stream at all
    out3 = jax.block_until_ready(dense_net_forward(x.astype(jnp.bfloat16), packed))
    assert out3.shape == (B, OUT_FEATURES)
    assert jnp.allclose(out3, out, atol=1e-4, rtol=1e-4)

    print("KERNEL_OK")
</pallas_src>

<mosaic_0001>
module attributes {stable_mosaic.version = 11 : i64} {
  func.func @mlp_kernel(%arg0: i32, %arg1: memref<8x784xf32, #tpu.memory_space<vmem>>, %arg2: memref<784x128xbf16, #tpu.memory_space<vmem>>, %arg3: memref<1x128xf32, #tpu.memory_space<vmem>>, %arg4: memref<128x128xbf16, #tpu.memory_space<vmem>>, %arg5: memref<1x128xf32, #tpu.memory_space<vmem>>, %arg6: memref<128x128xbf16, #tpu.memory_space<vmem>>, %arg7: memref<1x128xf32, #tpu.memory_space<vmem>>, %arg8: memref<8x128xbf16, #tpu.memory_space<vmem>>) attributes {dimension_semantics = [#tpu.dimension_semantics<parallel>], iteration_bounds = array<i64: 1>, scalar_prefetch = 0 : i64, scratch_operands = 0 : i64, tpu.core_type = #tpu.core_type<tc>, window_params = [{transform_indices = @transform_0, window_bounds = array<i64: 8, 784>}, {pipeline_mode = #tpu.pipeline_mode<synchronous>, transform_indices = @transform_1, window_bounds = array<i64: 784, 128>}, {pipeline_mode = #tpu.pipeline_mode<synchronous>, transform_indices = @transform_2, window_bounds = array<i64: 1, 128>}, {pipeline_mode = #tpu.pipeline_mode<synchronous>, transform_indices = @transform_3, window_bounds = array<i64: 128, 128>}, {pipeline_mode = #tpu.pipeline_mode<synchronous>, transform_indices = @transform_4, window_bounds = array<i64: 1, 128>}, {pipeline_mode = #tpu.pipeline_mode<synchronous>, transform_indices = @transform_5, window_bounds = array<i64: 128, 128>}, {pipeline_mode = #tpu.pipeline_mode<synchronous>, transform_indices = @transform_6, window_bounds = array<i64: 1, 128>}, {transform_indices = @transform_7, window_bounds = array<i64: 8, 128>}]} {
    %c0 = arith.constant 0 : index
    %c0_0 = arith.constant 0 : index
    %0 = vector.load %arg1[%c0, %c0_0] : memref<8x784xf32, #tpu.memory_space<vmem>>, vector<8x784xf32>
    %1 = arith.truncf %0 : vector<8x784xf32> to vector<8x784xbf16>
    %c0_1 = arith.constant 0 : index
    %c0_2 = arith.constant 0 : index
    %2 = vector.load %arg2[%c0_1, %c0_2] : memref<784x128xbf16, #tpu.memory_space<vmem>>, vector<784x128xbf16>
    %cst = arith.constant dense<0.000000e+00> : vector<8x128xf32>
    %3 = tpu.matmul %1, %2, %cst {dimension_numbers = #tpu.dot_dimension_numbers<[1], [0], [0], [1], [0, 0, 1, 1], [], []>} : vector<8x784xbf16>, vector<784x128xbf16>, vector<8x128xf32> -> vector<8x128xf32>
    %c0_3 = arith.constant 0 : index
    %c0_4 = arith.constant 0 : index
    %4 = vector.load %arg3[%c0_3, %c0_4] : memref<1x128xf32, #tpu.memory_space<vmem>>, vector<1x128xf32>
    %5 = vector.broadcast %4 : vector<1x128xf32> to vector<8x128xf32>
    %6 = arith.addf %3, %5 : vector<8x128xf32>
    %7 = arith.negf %6 : vector<8x128xf32>
    %8 = math.exp %7 : vector<8x128xf32>
    %cst_5 = arith.constant 1.000000e+00 : f32
    %9 = vector.broadcast %cst_5 : f32 to vector<8x128xf32>
    %10 = arith.addf %9, %8 : vector<8x128xf32>
    %11 = arith.divf %9, %10 : vector<8x128xf32>
    %12 = arith.truncf %11 : vector<8x128xf32> to vector<8x128xbf16>
    %c0_6 = arith.constant 0 : index
    %c0_7 = arith.constant 0 : index
    %13 = vector.load %arg4[%c0_6, %c0_7] : memref<128x128xbf16, #tpu.memory_space<vmem>>, vector<128x128xbf16>
    %cst_8 = arith.constant dense<0.000000e+00> : vector<8x128xf32>
    %14 = tpu.matmul %12, %13, %cst_8 {dimension_numbers = #tpu.dot_dimension_numbers<[1], [0], [0], [1], [0, 0, 1, 1], [], []>} : vector<8x128xbf16>, vector<128x128xbf16>, vector<8x128xf32> -> vector<8x128xf32>
    %c0_9 = arith.constant 0 : index
    %c0_10 = arith.constant 0 : index
    %15 = vector.load %arg5[%c0_9, %c0_10] : memref<1x128xf32, #tpu.memory_space<vmem>>, vector<1x128xf32>
    %16 = vector.broadcast %15 : vector<1x128xf32> to vector<8x128xf32>
    %17 = arith.addf %14, %16 : vector<8x128xf32>
    %18 = arith.negf %17 : vector<8x128xf32>
    %19 = math.exp %18 : vector<8x128xf32>
    %cst_11 = arith.constant 1.000000e+00 : f32
    %20 = vector.broadcast %cst_11 : f32 to vector<8x128xf32>
    %21 = arith.addf %20, %19 : vector<8x128xf32>
    %22 = arith.divf %20, %21 : vector<8x128xf32>
    %23 = arith.truncf %22 : vector<8x128xf32> to vector<8x128xbf16>
    %c0_12 = arith.constant 0 : index
    %c0_13 = arith.constant 0 : index
    %24 = vector.load %arg6[%c0_12, %c0_13] : memref<128x128xbf16, #tpu.memory_space<vmem>>, vector<128x128xbf16>
    %cst_14 = arith.constant dense<0.000000e+00> : vector<8x128xf32>
    %25 = tpu.matmul %23, %24, %cst_14 {dimension_numbers = #tpu.dot_dimension_numbers<[1], [0], [0], [1], [0, 0, 1, 1], [], []>} : vector<8x128xbf16>, vector<128x128xbf16>, vector<8x128xf32> -> vector<8x128xf32>
    %c0_15 = arith.constant 0 : index
    %c0_16 = arith.constant 0 : index
    %26 = vector.load %arg7[%c0_15, %c0_16] : memref<1x128xf32, #tpu.memory_space<vmem>>, vector<1x128xf32>
    %27 = vector.broadcast %26 : vector<1x128xf32> to vector<8x128xf32>
    %28 = arith.addf %25, %27 : vector<8x128xf32>
    %29 = arith.truncf %28 : vector<8x128xf32> to vector<8x128xbf16>
    %c0_17 = arith.constant 0 : index
    %c0_18 = arith.constant 0 : index
    %30 = vector.load %arg8[%c0_17, %c0_18] : memref<8x128xbf16, #tpu.memory_space<vmem>>, vector<8x128xbf16>
    tpu.vector_store %arg8[%c0_17, %c0_18], %29 {strides = array<i32>} : memref<8x128xbf16, #tpu.memory_space<vmem>>, vector<8x128xbf16>,
    return
  }
  func.func @transform_0(%arg0: i32) -> (i32, i32) {
    %c0_i32 = arith.constant 0 : i32
    %c0_i32_0 = arith.constant 0 : i32
    return %arg0, %c0_i32 : i32, i32
  }
  func.func @transform_1(%arg0: i32) -> (i32, i32) {
    %c0_i32 = arith.constant 0 : i32
    %c0_i32_0 = arith.constant 0 : i32
    %c0_i32_1 = arith.constant 0 : i32
    return %c0_i32, %c0_i32_0 : i32, i32
  }
  func.func @transform_2(%arg0: i32) -> (i32, i32) {
    %c0_i32 = arith.constant 0 : i32
    %c0_i32_0 = arith.constant 0 : i32
    %c0_i32_1 = arith.constant 0 : i32
    return %c0_i32, %c0_i32_0 : i32, i32
  }
  func.func @transform_3(%arg0: i32) -> (i32, i32) {
    %c0_i32 = arith.constant 0 : i32
    %c0_i32_0 = arith.constant 0 : i32
    %c0_i32_1 = arith.constant 0 : i32
    return %c0_i32, %c0_i32_0 : i32, i32
  }
  func.func @transform_4(%arg0: i32) -> (i32, i32) {
    %c0_i32 = arith.constant 0 : i32
    %c0_i32_0 = arith.constant 0 : i32
    %c0_i32_1 = arith.constant 0 : i32
    return %c0_i32, %c0_i32_0 : i32, i32
  }
  func.func @transform_5(%arg0: i32) -> (i32, i32) {
    %c0_i32 = arith.constant 0 : i32
    %c0_i32_0 = arith.constant 0 : i32
    %c0_i32_1 = arith.constant 0 : i32
    return %c0_i32, %c0_i32_0 : i32, i32
  }
  func.func @transform_6(%arg0: i32) -> (i32, i32) {
    %c0_i32 = arith.constant 0 : i32
    %c0_i32_0 = arith.constant 0 : i32
    %c0_i32_1 = arith.constant 0 : i32
    return %c0_i32, %c0_i32_0 : i32, i32
  }
  func.func @transform_7(%arg0: i32) -> (i32, i32) {
    %c0_i32 = arith.constant 0 : i32
    %c0_i32_0 = arith.constant 0 : i32
    return %arg0, %c0_i32 : i32, i32
  }
}

</mosaic_0001>

<bundles_post_ra>
// kernel: tpu_custom_call.1
= control target key start
LH: loop header
LB: loop body
LE: loop exit
PB: predicated region body
PF: predicated region fallthrough
CT: control target
= control target key end

     0   :  { %12 = vsyncpa [#allocation3], 0  ;;  %s1466_s0 = inlined_call_operand.hbm [shape: f32[8,784], index: 0, kind: input, shape index: {}]   ;;  %s1467_s1 = inlined_call_operand.hbm [shape: bf16[784,128], index: 1, kind: input, shape index: {}]   ;;  %s1468_s2 = inlined_call_operand.vmem [shape: f32[1,128], index: 2, kind: input, shape index: {}]   ;;  %s1469_s3 = inlined_call_operand.hbm [shape: bf16[128,128], index: 3, kind: input, shape index: {}]   ;;  %s1470_s4 = inlined_call_operand.vmem [shape: f32[1,128], index: 4, kind: input, shape index: {}]   ;;  %s1471_s5 = inlined_call_operand.hbm [shape: bf16[128,128], index: 5, kind: input, shape index: {}]   ;;  %s1472_s6 = inlined_call_operand.vmem [shape: f32[1,128], index: 6, kind: input, shape index: {}]   ;;  %s1473_s7 = inlined_call_operand.hbm [shape: bf16[8,128], index: 7, kind: output, shape index: {}]  }
   0x1   :  { %13 = vsyncpa [#allocation6], 0 }
   0x2   :  { %14 = vsyncpa [#allocation9], 0 }
   0x3   :  { %15 = vsyncpa [#allocation4], 0  ;;  %s1316_s24 = smov [#allocation5]   ;;  %s1198_s28 = scalar_lea.hbm %s1467_s1, 6272 }
   0x4   :  { %s31_s25 = sshll.u32 %s1316_s24, 4  ;;  %p1199_p0 = scmp.ne.s32.totalorder %s1467_s1, %s1198_s28  ;;  %s32_s25 = int_to_ptr.vmem [resolvable:$true] %s31_s25 }
   0x5   :  { %p1202_p1 = scmp.lt.u32.totalorder %s1198_s28, %s1467_s1 }
   0x7   :  { %p1204_p2 = pnand %p1202_p1, %p1199_p0 }
   0x9   :  { %1207 = shalt.err (!%p1204_p2)
}
   0xa   :  { %s1208_s10 = scalar_lea.vmem %s32_s25, 6272  ;;  %p1213_p4 = scmp.lt.s32.totalorder %s32_s25, %s32_s25 }
   0xb   :  { %p1209_p3 = scmp.ne.s32.totalorder %s32_s25, %s1208_s10  ;;  %p1214_p5 = scmp.lt.s32.totalorder %s1208_s10, %s1208_s10 }
   0xd   :  { %p1215_p6 = por %p1214_p5, %p1213_p4 }
   0xf   :  { %p1216_p7 = pnand %p1215_p6, %p1209_p3 }
  0x11   :  { %1219 = shalt.err (!%p1216_p7)
}
  0x12   :  { %s1317_s11 = smov 64   ;;  %s1318_s12 = smov 4  }
  0x13   :  { %37 = dma.hbm_to_vmem [thread:$0]  %s1467_s1, 6272, %s32_s25, [#allocation6], %s1317_s11, %s1317_s11, %s1318_s12  }
  0x14   :  { %s1319_s15 = smov [#allocation2]   ;;  %s1320_s17 = smov [#allocation7]  }
  0x15   :  { %s22_s16 = sshll.u32 %s1319_s15, 4  ;;  %s45_s18 = sshll.u32 %s1320_s17, 4  ;;  %s23_s16 = int_to_ptr.vmem [resolvable:$true] %s22_s16  ;;  %s46_s18 = int_to_ptr.vmem [resolvable:$true] %s45_s18 }
  0x16   :  { %s1220_s21 = scalar_lea.hbm %s1466_s0, 896 }
  0x17   :  { %p1221_p8 = scmp.ne.s32.totalorder %s1466_s0, %s1220_s21  ;;  %p1224_p9 = scmp.lt.u32.totalorder %s1220_s21, %s1466_s0 }
  0x19   :  { %p1226_p10 = pnand %p1224_p9, %p1221_p8 }
  0x1b   :  { %1229 = shalt.err (!%p1226_p10)
}
  0x1c   :  { %s1230_s1 = scalar_lea.vmem %s23_s16, 896  ;;  %p1235_p12 = scmp.lt.s32.totalorder %s23_s16, %s23_s16 }
  0x1d   :  { %p1231_p11 = scmp.ne.s32.totalorder %s23_s16, %s1230_s1  ;;  %p1236_p13 = scmp.lt.s32.totalorder %s1230_s1, %s1230_s1 }
  0x1f   :  { %p1237_p0 = por %p1236_p13, %p1235_p12 }
  0x21   :  { %p1238_p1 = pnand %p1237_p0, %p1231_p11 }
  0x23   :  { %1241 = shalt.err (!%p1238_p1)
}
  0x24   :  { %25 = dma.hbm_to_vmem [thread:$0]  %s1466_s0, 896, %s23_s16, [#allocation3]  }
  0x25   :  { %s1242_s30 = scalar_lea.hbm %s1469_s3, 1024 }
  0x26   :  { %p1243_p2 = scmp.ne.s32.totalorder %s1469_s3, %s1242_s30  ;;  %p1246_p3 = scmp.lt.u32.totalorder %s1242_s30, %s1469_s3 }
  0x28   :  { %p1248_p4 = pnand %p1246_p3, %p1243_p2 }
  0x2a   :  { %1251 = shalt.err (!%p1248_p4)
}
  0x2b   :  { %s1252_s14 = scalar_lea.vmem %s46_s18, 1024  ;;  %p1257_p6 = scmp.lt.s32.totalorder %s46_s18, %s46_s18 }
  0x2c   :  { %p1253_p5 = scmp.ne.s32.totalorder %s46_s18, %s1252_s14  ;;  %p1258_p7 = scmp.lt.s32.totalorder %s1252_s14, %s1252_s14 }
  0x2e   :  { %p1259_p8 = por %p1258_p7, %p1257_p6 }
  0x30   :  { %p1260_p9 = pnand %p1259_p8, %p1253_p5 }
  0x32   :  { %1263 = shalt.err (!%p1260_p9)
}
  0x33   :  { %51 = dma.hbm_to_vmem [thread:$0]  %s1469_s3, 1024, %s46_s18, [#allocation6], %s1317_s11, %s1317_s11, %s1318_s12  }
  0x34   :  { %s1321_s16 = smov [#allocation8]   ;;  %s1264_s21 = scalar_lea.hbm %s1471_s5, 1024 }
  0x35   :  { %s59_s17 = sshll.u32 %s1321_s16, 4  ;;  %p1265_p10 = scmp.ne.s32.totalorder %s1471_s5, %s1264_s21  ;;  %s60_s17 = int_to_ptr.vmem [resolvable:$true] %s59_s17 }
  0x36   :  { %p1268_p11 = scmp.lt.u32.totalorder %s1264_s21, %s1471_s5 }
  0x38   :  { %p1270_p12 = pnand %p1268_p11, %p1265_p10 }
  0x3a   :  { %1273 = shalt.err (!%p1270_p12)
}
  0x3b   :  { %s1274_s1 = scalar_lea.vmem %s60_s17, 1024  ;;  %p1279_p0 = scmp.lt.s32.totalorder %s60_s17, %s60_s17 }
  0x3c   :  { %p1275_p13 = scmp.ne.s32.totalorder %s60_s17, %s1274_s1  ;;  %p1280_p1 = scmp.lt.s32.totalorder %s1274_s1, %s1274_s1 }
  0x3e   :  { %p1281_p2 = por %p1280_p1, %p1279_p0 }
  0x40   :  { %p1282_p3 = pnand %p1281_p2, %p1275_p13 }
  0x42   :  { %1285 = shalt.err (!%p1282_p3)
}
  0x43   :  { %65 = dma.hbm_to_vmem [thread:$0]  %s1471_s5, 1024, %s60_s17, [#allocation9], %s1317_s11, %s1317_s11, %s1318_s12  }
  0x44   :  { %1308 = dma.done.wait [#allocation3], 896  }
  0x45   :  { %1309 = vsyncadd [#allocation3], 4294966400 }
  0x46   :  { %1310 = dma.done.wait [#allocation6], 7296  }
  0x47   :  { %1311 = vsyncadd [#allocation6], 4294960000 }
  0x48   :  { %1312 = dma.done.wait [#allocation9], 1024  }
  0x49   :  { %1313 = vsyncadd [#allocation9], 4294966272  ;;  %v1125_v0 = vld [vmem:[#allocation5 + $0x40] sm:$0xff]   ;;  %v1129_v4 = vld [vmem:[#allocation5 + $0x48] sm:$0xff]   ;;  %v1322_v44 = vmov 0.0   ;;  %vm1323_vm0 = vmmov 0  }
  0x4a   :  { %v1126_v1 = vld [vmem:[#allocation5] sm:$0xff]   ;;  %984 = vmatprep.subr.bf16.mxu0 %v1125_v0  ;;  %v1130_v5 = vld [vmem:[#allocation5 + $0x8] sm:$0xff]   ;;  %v1133_v8 = vld [vmem:[#allocation5 + $0x50] sm:$0xff]   ;;  %vm494_vm1 = vcmask 130048   ;;  %s1324_s28 = smov [#allocation10]  }
  0x4b   :  { %v1127_v2 = vld [vmem:[#allocation5 + $0xc0] sm:$0xff]   ;;  %985 = vmatpush3.bf16.msra.mxu0 %v1126_v1  ;;  %v1131_v6 = vld [vmem:[#allocation5 + $0xc8] sm:$0xff]   ;;  %v1134_v9 = vld [vmem:[#allocation5 + $0x10] sm:$0xff]  }
  0x4c   :  { %v1128_v3 = vld [vmem:[#allocation5 + $0x80] sm:$0xff]   ;;  %1006 = vmatprep.subr.bf16.mxu1 %v1127_v2  ;;  %986 = vmatprep.subr.bf16.mxu0 %v1129_v4  ;;  %v1132_v7 = vld [vmem:[#allocation5 + $0x88] sm:$0xff]   ;;  %v1135_v10 = vld [vmem:[#allocation5 + $0xd0] sm:$0xff]  }
  0x4d   :  { %1007 = vmatpush3.bf16.msra.mxu1 %v1128_v3  ;;  %v1136_v11 = vld [vmem:[#allocation5 + $0x90] sm:$0xff]   ;;  %v1137_v12 = vld [vmem:[#allocation5 + $0x58] sm:$0xff]   ;;  %v1141_v16 = vld [vmem:[#allocation5 + $0x60] sm:$0xff]  }
  0x4e   :  { %1008 = vmatprep.subr.bf16.mxu1 %v1131_v6  ;;  %v1138_v13 = vld [vmem:[#allocation5 + $0x18] sm:$0xff]   ;;  %v1142_v17 = vld [vmem:[#allocation5 + $0x20] sm:$0xff]   ;;  %v1145_v20 = vld [vmem:[#allocation5 + $0x68] sm:$0xff]  }
  0x4f   :  { %987 = vmatpush3.bf16.msra.mxu0 %v1130_v5  ;;  %v1139_v14 = vld [vmem:[#allocation5 + $0xd8] sm:$0xff]   ;;  %v1143_v18 = vld [vmem:[#allocation5 + $0xe0] sm:$0xff]   ;;  %v1146_v21 = vld [vmem:[#allocation5 + $0x28] sm:$0xff]  }
  0x50   :  { %988 = vmatprep.subr.bf16.mxu0 %v1133_v8  ;;  %v1140_v15 = vld [vmem:[#allocation5 + $0x98] sm:$0xff]   ;;  %v1144_v19 = vld [vmem:[#allocation5 + $0xa0] sm:$0xff]   ;;  %v1147_v22 = vld [vmem:[#allocation5 + $0xe8] sm:$0xff]  }
  0x51   :  { %1009 = vmatpush3.bf16.msra.mxu1 %v1132_v7  ;;  %v1148_v23 = vld [vmem:[#allocation5 + $0xa8] sm:$0xff]   ;;  %v1149_v24 = vld [vmem:[#allocation5 + $0x70] sm:$0xff]   ;;  %v1153_v28 = vld [vmem:[#allocation5 + $0x78] sm:$0xff]  }
  0x52   :  { %1010 = vmatprep.subr.bf16.mxu1 %v1135_v10  ;;  %v1150_v25 = vld [vmem:[#allocation5 + $0x30] sm:$0xff]   ;;  %v1154_v29 = vld [vmem:[#allocation5 + $0x38] sm:$0xff]   ;;  %v81_v34 = vld [vmem:[#allocation2] sm:$0xff] }
  0x53   :  { %989 = vmatpush3.bf16.msra.mxu0 %v1134_v9  ;;  %v1151_v26 = vld [vmem:[#allocation5 + $0xf0] sm:$0xff]   ;;  %v1155_v30 = vld [vmem:[#allocation5 + $0xf8] sm:$0xff]   ;;  %v88_v35 = vpack.c.bf16 %v81_v34, %v81_v34  ;;  %v1157_v36 = vld [vmem:[#allocation5 + $0x140] sm:$0xff]  }
  0x54   :  { %990 = vmatprep.subr.bf16.mxu0 %v1137_v12  ;;  %v1152_v27 = vld [vmem:[#allocation5 + $0xb0] sm:$0xff]   ;;  %v1156_v33 = vld [vmem:[#allocation5 + $0xb8] sm:$0xff]   ;;  %v84_v37 = vld [vmem:[#allocation2 + $0x18] sm:$0xff] }
  0x55   :  { %1011 = vmatpush3.bf16.msra.mxu1 %v1136_v11  ;;  %v82_v31 = vld [vmem:[#allocation2 + $0x8] sm:$0xff]  ;;  %v91_v38 = vpack.c.bf16 %v84_v37, %v84_v37  ;;  %v1158_v39 = vld [vmem:[#allocation5 + $0x100] sm:$0xff]   ;;  %v83_v40 = vld [vmem:[#allocation2 + $0x10] sm:$0xff] }
  0x56   :  { %1012 = vmatprep.subr.bf16.mxu1 %v1139_v14  ;;  %v89_v32 = vpack.c.bf16 %v82_v31, %v82_v31  ;;  %v90_v41 = vpack.c.bf16 %v83_v40, %v83_v40  ;;  %v1159_v42 = vld [vmem:[#allocation5 + $0x148] sm:$0xff]   ;;  %v1161_v45 = vld [vmem:[#allocation5 + $0x150] sm:$0xff]   ;;  %v1163_v47 = vld [vmem:[#allocation5 + $0x158] sm:$0xff]  }
  0x57   :  { %991 = vmatpush3.bf16.msra.mxu0 %v1138_v13  ;;  %570 = vmatprep.mubr.bf16.mxu1 %v91_v38  ;;  %v1160_v43 = vld [vmem:[#allocation5 + $0x108] sm:$0xff]   ;;  %v1162_v46 = vld [vmem:[#allocation5 + $0x110] sm:$0xff]   ;;  %v1164_v48 = vld [vmem:[#allocation5 + $0x118] sm:$0xff]  }
  0x58   :  { %992 = vmatprep.subr.bf16.mxu0 %v1141_v16  ;;  %530 = vmatprep.mubr.bf16.mxu0 %v89_v32  ;;  %v1165_v49 = vld [vmem:[#allocation5 + $0x160] sm:$0xff]   ;;  %v1167_v51 = vld [vmem:[#allocation5 + $0x168] sm:$0xff]   ;;  %v86_v54 = vld [vmem:[#allocation2 + $0x28] sm:$0xff] }
  0x59   :  { %1013 = vmatpush3.bf16.msra.mxu1 %v1140_v15  ;;  %v1166_v50 = vld [vmem:[#allocation5 + $0x120] sm:$0xff]   ;;  %v1168_v52 = vld [vmem:[#allocation5 + $0x128] sm:$0xff]   ;;  %v1169_v55 = vld [vmem:[#allocation5 + $0x170] sm:$0xff]   ;;  %v93_v56 = vpack.c.bf16 %v86_v54, %v86_v54 }
  0x5a   :  { %1014 = vmatprep.subr.bf16.mxu1 %v1143_v18  ;;  %v1173_v53 = vld [vmem:[#allocation5 + $0x180] sm:$0xff]   ;;  %v87_v57 = vld [vmem:[#allocation2 + $0x30] sm:$0xff]  ;;  %v1170_v59 = vld [vmem:[#allocation5 + $0x130] sm:$0xff]  }
  0x5b   :  { %993 = vmatpush3.bf16.msra.mxu0 %v1142_v17  ;;  %v94_v58 = vpack.c.bf16 %v87_v57, %v87_v57  ;;  %v1171_v60 = vld [vmem:[#allocation5 + $0x178] sm:$0xff]   ;;  %v85_v62 = vld [vmem:[#allocation2 + $0x20] sm:$0xff]  ;;  %v1175_v1 = vld [vmem:[#allocation7 + $0x8] sm:$0xff]  }
  0x5c   :  { %994 = vmatprep.subr.bf16.mxu0 %v1145_v20  ;;  %v1172_v61 = vld [vmem:[#allocation5 + $0x138] sm:$0xff]   ;;  %v92_v63 = vpack.c.bf16 %v85_v62, %v85_v62  ;;  %v1174_v0 = vld [vmem:[#allocation7] sm:$0xff]   ;;  %v1177_v3 = vld [vmem:[#allocation7 + $0x18] sm:$0xff]  }
  0x5d   :  { %1015 = vmatpush3.bf16.msra.mxu1 %v1144_v19  ;;  %v1176_v2 = vld [vmem:[#allocation7 + $0x10] sm:$0xff]   ;;  %v1178_v4 = vld [vmem:[#allocation7 + $0x20] sm:$0xff]   ;;  %v1179_v5 = vld [vmem:[#allocation7 + $0x28] sm:$0xff]  }
  0x5e   :  { %1016 = vmatprep.subr.bf16.mxu1 %v1147_v22  ;;  %v1180_v6 = vld [vmem:[#allocation7 + $0x30] sm:$0xff]   ;;  %v1181_v7 = vld [vmem:[#allocation7 + $0x38] sm:$0xff]   ;;  %v913_v9 = vld [vmem:[%s1468_s2] ss:$0 sm:$0xff] }
  0x5f   :  { %995 = vmatpush3.bf16.msra.mxu0 %v1146_v21  ;;  %v1182_v37 = vld [vmem:[#allocation8] sm:$0xff]   ;;  %v1183_v38 = vld [vmem:[#allocation8 + $0x8] sm:$0xff]   ;;  %v1185_v40 = vld [vmem:[#allocation8 + $0x18] sm:$0xff]  }
  0x60   :  { %996 = vmatprep.subr.bf16.mxu0 %v1149_v24 }
  0x61   :  { %1017 = vmatpush3.bf16.msra.mxu1 %v1148_v23 }
  0x62   :  { %1018 = vmatprep.subr.bf16.mxu1 %v1151_v26 }
  0x63   :  { %997 = vmatpush3.bf16.msra.mxu0 %v1150_v25 }
  0x64   :  { %998 = vmatprep.subr.bf16.mxu0 %v1153_v28 }
  0x65   :  { %1019 = vmatpush3.bf16.msra.mxu1 %v1152_v27 }
  0x66   :  { %1020 = vmatprep.subr.bf16.mxu1 %v1155_v30 }
  0x67   :  { %999 = vmatpush3.bf16.msra.mxu0 %v1154_v29 }
  0x68   :  { %1028 = vmatprep.subr.bf16.mxu0 %v1157_v36 }
  0x69   :  { %1021 = vmatpush3.bf16.msra.mxu1 %v1156_v33 }
  0x6a   :  { %531 = vmatmul.mubr.bf16.vlgmr.msra.gmra.mrb[0].mxu0 %v88_v35  ;;  %1070 = vmatprep.subr.bf16.mxu1 %v1322_v44 }
  0x6b   :  { %1029 = vmatpush3.bf16.msra.mxu0 %v1158_v39  ;;  %610 = vmatprep.mubr.bf16.mxu0 %v93_v56  ;;  %v1184_v39 = vld [vmem:[#allocation8 + $0x10] sm:$0xff]  }
  0x6c   :  { %571 = vmatmul.mubr.bf16.vlgmr.msra.gmra.mrb[0].mxu1 %v90_v41  ;;  %1030 = vmatprep.subr.bf16.mxu0 %v1159_v42  ;;  %v1186_v41 = vld [vmem:[#allocation8 + $0x20] sm:$0xff]   ;;  %v1187_v42 = vld [vmem:[#allocation8 + $0x28] sm:$0xff]  }
  0x6d   :  { %1072 = vmatprep.mubr.msk.bf16.mxu1 %vm1323_vm0, %v1322_v44  ;;  %1071 = vmatpush3.bf16.msra.mxu1 %v1173_v53 }
  0x6e   :  { %1076 = vmatprep.subr.bf16.mxu1 %v1322_v44 }
  0x6f   :  { %1031 = vmatpush3.bf16.msra.mxu0 %v1160_v43  ;;  %v1188_v43 = vld [vmem:[#allocation8 + $0x30] sm:$0xff]  }
  0x70   :  { %1032 = vmatprep.subr.bf16.mxu0 %v1161_v45  ;;  %v1189_v45 = vld [vmem:[#allocation8 + $0x38] sm:$0xff]  }
  0x73   :  { %1033 = vmatpush3.bf16.msra.mxu0 %v1162_v46  ;;  %v965_v46 = vld [vmem:[%s1470_s4] ss:$0 sm:$0xff]  ;;  %s902_s4 = sshll.u32 %s1324_s28, 4  ;;  %s903_s4 = int_to_ptr.vmem [resolvable:$true] %s902_s4 }
  0x74   :  { %1034 = vmatprep.subr.bf16.mxu0 %v1163_v47  ;;  %1073 = vmatmul.mubr.msk.bf16.vlgmr.msra.gmra.mrb[4].mxu1 %vm494_vm1, %v94_v58  ;;  %s1286_s29 = scalar_lea.vmem %s903_s4, 64  ;;  %p1291_p5 = scmp.lt.s32.totalorder %s903_s4, %s903_s4 }
  0x75   :  { %1092 = vmatprep.mubr.msk.bf16.mxu1 %vm1323_vm0, %v1322_v44  ;;  %1077 = vmatpush3.bf16.msra.mxu1 %v1174_v0  ;;  %p1287_p4 = scmp.ne.s32.totalorder %s903_s4, %s1286_s29  ;;  %p1292_p6 = scmp.lt.s32.totalorder %s1286_s29, %s1286_s29 }
  0x76   :  { %1078 = vmatprep.subr.bf16.mxu1 %v1322_v44 }
  0x77   :  { %1035 = vmatpush3.bf16.msra.mxu0 %v1164_v48  ;;  %p1293_p7 = por %p1292_p6, %p1291_p5 }
  0x78   :  { %1036 = vmatprep.subr.bf16.mxu0 %v1165_v49 }
  0x79   :  { %1079 = vmatpush3.bf16.msra.mxu1 %v1175_v1  ;;  %p1294_p8 = pnand %p1293_p7, %p1287_p4 }
  0x7a   :  { %1080 = vmatprep.subr.bf16.mxu1 %v1322_v44 }
  0x7b   :  { %1037 = vmatpush3.bf16.msra.mxu0 %v1166_v50 }
  0x7c   :  { %1038 = vmatprep.subr.bf16.mxu0 %v1167_v51 }
  0x7d   :  { %1081 = vmatpush3.bf16.msra.mxu1 %v1176_v2 }
  0x7e   :  { %1082 = vmatprep.subr.bf16.mxu1 %v1322_v44 }
  0x7f   :  { %1039 = vmatpush3.bf16.msra.mxu0 %v1168_v52 }
  0x80   :  { %1040 = vmatprep.subr.bf16.mxu0 %v1169_v55 }
  0x81   :  { %1083 = vmatpush3.bf16.msra.mxu1 %v1177_v3 }
  0x82   :  { %1084 = vmatprep.subr.bf16.mxu1 %v1322_v44 }
  0x83   :  { %1041 = vmatpush3.bf16.msra.mxu0 %v1170_v59 }
  0x84   :  { %1042 = vmatprep.subr.bf16.mxu0 %v1171_v60 }
  0x85   :  { %1085 = vmatpush3.bf16.msra.mxu1 %v1178_v4 }
  0x86   :  { %1086 = vmatprep.subr.bf16.mxu1 %v1322_v44 }
  0x87   :  { %1043 = vmatpush3.bf16.msra.mxu0 %v1172_v61 }
  0x88   :  { %1096 = vmatprep.subr.bf16.mxu0 %v1322_v44 }
  0x89   :  { %1087 = vmatpush3.bf16.msra.mxu1 %v1179_v5 }
  0x8a   :  { %611 = vmatmul.mubr.bf16.vlgmr.msra.gmra.mrb[4].mxu0 %v92_v63  ;;  %1088 = vmatprep.subr.bf16.mxu1 %v1322_v44 }
  0x8b   :  { %1112 = vmatprep.mubr.msk.bf16.mxu0 %vm1323_vm0, %v1322_v44  ;;  %1097 = vmatpush3.bf16.msra.mxu0 %v1182_v37 }
  0x8c   :  { %1098 = vmatprep.subr.bf16.mxu0 %v1322_v44 }
  0x8d   :  { %1089 = vmatpush3.bf16.msra.mxu1 %v1180_v6 }
  0x8e   :  { %1090 = vmatprep.subr.bf16.mxu1 %v1322_v44 }
  0x8f   :  { %1099 = vmatpush3.bf16.msra.mxu0 %v1183_v38 }
  0x90   :  { %1100 = vmatprep.subr.bf16.mxu0 %v1322_v44 }
  0x91   :  { %1091 = vmatpush3.bf16.msra.mxu1 %v1181_v7 }
  0x93   :  { %1101 = vmatpush3.bf16.msra.mxu0 %v1184_v39 }
  0x94   :  { %1102 = vmatprep.subr.bf16.mxu0 %v1322_v44 }
  0x97   :  { %1103 = vmatpush3.bf16.msra.mxu0 %v1185_v40 }
  0x98   :  { %1104 = vmatprep.subr.bf16.mxu0 %v1322_v44 }
  0x9b   :  { %1105 = vmatpush3.bf16.msra.mxu0 %v1186_v41 }
  0x9c   :  { %1106 = vmatprep.subr.bf16.mxu0 %v1322_v44 }
  0x9f   :  { %1107 = vmatpush3.bf16.msra.mxu0 %v1187_v42 }
  0xa0   :  { %1108 = vmatprep.subr.bf16.mxu0 %v1322_v44 }
  0xa3   :  { %1109 = vmatpush3.bf16.msra.mxu0 %v1188_v43 }
  0xa4   :  { %1110 = vmatprep.subr.bf16.mxu0 %v1322_v44  ;;  %v975_v44 = vld [vmem:[%s1472_s6] ss:$0 sm:$0xff] }
  0xa7   :  { %1111 = vmatpush3.bf16.msra.mxu0 %v1189_v45 }
 0x13d   :  { %v1000_v8 = vpop.f32.mrb[0].mxu0 }
 0x13e   :  { %v1001_v10 = vpop.f32.mrb[1].mxu0 }
 0x13f   :  { %v1002_v11 = vadd.f32 %v1001_v10, %v1000_v8  ;;  %v1003_v12 = vpop.f32.mrb[2].mxu0  ;;  %v1022_v13 = vpop.f32.mrb[0].mxu1 }
 0x140   :  { %v1004_v14 = vpop.f32.mrb[3].mxu0  ;;  %v1023_v16 = vpop.f32.mrb[1].mxu1 }
 0x141   :  { %v533_v15 = vadd.f32 %v1002_v11, %v913_v9  ;;  %v1024_v17 = vadd.f32 %v1023_v16, %v1022_v13  ;;  %v1025_v18 = vpop.f32.mrb[2].mxu1 }
 0x142   :  { %v1026_v19 = vpop.f32.mrb[3].mxu1 }
 0x143   :  { %v573_v20 = vadd.f32 %v1024_v17, %v533_v15 }
 0x147   :  { %v652_v21 = vpop.f32.mrb[4].mxu1 }
 0x148   :  { %v1074_v22 = vpop.f32.mrb[5].mxu1 }
 0x149   :  { %v655_v23 = vpop.f32.mrb[6].mxu1 }
 0x14a   :  { %v1075_v24 = vpop.f32.mrb[7].mxu1 }
 0x15d   :  { %v1044_v25 = vpop.f32.mrb[4].mxu0 }
 0x15e   :  { %v1045_v26 = vpop.f32.mrb[5].mxu0 }
 0x15f   :  { %v1046_v27 = vadd.f32 %v1045_v26, %v1044_v25  ;;  %v1047_v28 = vpop.f32.mrb[6].mxu0 }
 0x160   :  { %v1048_v29 = vpop.f32.mrb[7].mxu0 }
 0x161   :  { %v613_v30 = vadd.f32 %v1046_v27, %v573_v20 }
 0x163   :  { %v653_v31 = vadd.f32 %v652_v21, %v613_v30 }
 0x165   :  { %v964_v32 = vmul.f32 -1.442695, %v653_v31 }
 0x167   :  { %1190 = vpow2.f32 %v964_v32 }
 0x171   :  { %v1191_v33 = vpop.eup %1190 }
 0x172   :  { %v661_v34 = vadd.f32 1.0, %v1191_v33 }
 0x174   :  { %1192 = vrcp.f32 %v661_v34 }
 0x17e   :  { %v1193_v35 = vpop.eup %1192 }
 0x17f   :  { %v664_v36 = vpack.c.bf16 %v1193_v35, %v1193_v35 }
 0x181   :  { %1093 = vmatmul.mubr.bf16.vlgmr.msra.gmra.mrb[8].mxu1 %v664_v36 }
 0x254   :  { %v770_v47 = vpop.f32.mrb[8].mxu1 }
 0x255   :  { %v771_v48 = vadd.f32 %v965_v46, %v770_v47  ;;  %v1094_v49 = vpop.f32.mrb[9].mxu1 }
 0x256   :  { %v773_v50 = vpop.f32.mrb[10].mxu1 }
 0x257   :  { %v974_v51 = vmul.f32 -1.442695, %v771_v48  ;;  %v1095_v52 = vpop.f32.mrb[11].mxu1 }
 0x259   :  { %1194 = vpow2.f32 %v974_v51 }
 0x263   :  { %v1195_v53 = vpop.eup %1194 }
 0x264   :  { %v779_v54 = vadd.f32 1.0, %v1195_v53 }
 0x266   :  { %1196 = vrcp.f32 %v779_v54 }
 0x270   :  { %v1197_v55 = vpop.eup %1196 }
 0x271   :  { %v782_v56 = vpack.c.bf16 %v1197_v55, %v1197_v55 }
 0x273   :  { %1113 = vmatmul.mubr.bf16.vlgmr.msra.gmra.mrb[8].mxu0 %v782_v56 }
 0x346   :  { %v888_v57 = vpop.f32.mrb[8].mxu0 }
 0x347   :  { %v889_v58 = vadd.f32 %v975_v44, %v888_v57  ;;  %v1114_v59 = vpop.f32.mrb[9].mxu0 }
 0x348   :  { %v891_v60 = vpop.f32.mrb[10].mxu0 }
 0x349   :  { %v894_v61 = vpack.c.bf16 %v889_v58, %v889_v58  ;;  %v1115_v62 = vpop.f32.mrb[11].mxu0 }
 0x34b   :  { %895 = vst [vmem:[#allocation10] sm:$0xf] %v894_v61 }
 0x34c   :  { %1297 = shalt.err (!%p1294_p8)
}
 0x34d   :  { %s1298_s6 = scalar_lea.hbm %s1473_s7, 64 }
 0x34e   :  { %p1299_p9 = scmp.ne.s32.totalorder %s1473_s7, %s1298_s6  ;;  %p1302_p10 = scmp.lt.u32.totalorder %s1298_s6, %s1473_s7 }
 0x350   :  { %p1304_p11 = pnand %p1302_p10, %p1299_p9 }
 0x352   :  { %1307 = shalt.err (!%p1304_p11)
}
 0x353   :  { %905 = dma.vmem_to_hbm [thread:$0]  %s903_s4, 64, %s1473_s7, [#allocation4]  }
 0x354   :  { %1314 = dma.done.wait [#allocation4], 64  }
 0x355   :  { %1315 = vsyncadd [#allocation4], 4294967232 }
 0x356   :  { %909 = vsyncpa [#allocation3], 1 }
 0x357   :  { %910 = vsyncpa [#allocation6], 1 }
 0x358   :  { %911 = vsyncpa [#allocation9], 1 }
 0x359   :  { %912 = vsyncpa [#allocation4], 1 }

</bundles_post_ra>
